<compile_context>
chip_gen: v6e
topology: v6e:2x2x1
jax: 0.10.0
libtpu: 0.0.40
codegen_flags: <defaults>
</compile_context>

<pallas_src>
import functools
import numpy as np
import jax
import jax.numpy as jnp
from jax.experimental import pallas as pl
from jax.experimental.pallas import tpu as pltpu

# ---- configuration mirroring MLP(**kwargs) ---------------------------------
INPUTS = ["obs", "act"]                     # len > 1 -> 'merge' inflow
OUTPUTS = ["mu", "logvar"]                  # len > 1 -> 'fork' outflow
STATE_SPEC = {"obs": (16,), "act": (16,), "mu": (8,), "logvar": (8,)}
N_LAYERS = 3                                # layer_spec = {'n_layers': 3}
# nonlin = nn.Tanh


# ---- Pallas kernel: fused merge -> Linear/Tanh chain -> single output slab --
def mlp_kernel(*refs, n_in):
    """refs = (x_0..x_{n_in-1},
               w0_part_0..w0_part_{n_in-1}, b0,
               w1, b1, ..., w_{L-1}, b_{L-1},
               out_fused)"""
    in_refs = refs[:n_in]
    out_ref = refs[-1]
    params = refs[n_in:-1]

    # ---- layer 0: fused 'merge' -- one partial matmul per input term -------
    w0_parts = params[:n_in]
    b0 = params[n_in][...]                          # (1, d1)
    h = jnp.dot(in_refs[0][...].astype(jnp.float32), w0_parts[0][...],
                preferred_element_type=jnp.float32)
    for t in range(1, n_in):
        h = h + jnp.dot(in_refs[t][...].astype(jnp.float32), w0_parts[t][...],
                        preferred_element_type=jnp.float32)
    h = jnp.tanh(h + b0)

    # ---- remaining layers (all f32: correct on v5e, free slack elsewhere) --
    rest = params[n_in + 1:]
    for i in range(len(rest) // 2):
        w = rest[2 * i][...]                        # (d_i, d_{i+1})
        b = rest[2 * i + 1][...]                    # (1, d_{i+1})
        h = jnp.tanh(jnp.dot(h, w, preferred_element_type=jnp.float32) + b)

    # ---- single fused output slab; 'fork' split happens in the wrapper -----
    out_ref[...] = h.astype(out_ref.dtype)


_TILE_CANDIDATES = (16384, 8192, 4096, 2048, 1024, 512, 256, 128, 64, 32, 16, 8)


def _choose_batch_tile(B, max_tb):
    """Tiny batches run in one step (latency-bound path).  Large batches pick
    the biggest tile <= max_tb that still yields >= 2 grid steps so the
    'parallel' axis can be sharded across v7x's two TensorCores."""
    if B <= 256 and B <= max_tb:
        return B
    for tb in _TILE_CANDIDATES:
        if tb <= max_tb and 2 * tb <= B:
            return tb
    return 8  # unreachable for max_tb >= 8 and B > 256; kept for safety


def mlp_forward(inputs, weights, biases, out_dims, *, max_tb=8192):
    """inputs: list of (B, d_in_t); weights[i]: (d_{i-1}, d_i); biases[i]: (1, d_i).
    Returns a list of (B, d_out_t) arrays (one per output term), in the
    activation dtype of `inputs` (pass bf16 activations for halved HBM traffic
    on v6e/v7x; math stays f32 inside the kernel)."""
    B = int(inputs[0].shape[0])
    io_dtype = inputs[0].dtype
    in_dims = [int(x.shape[1]) for x in inputs]
    n_in = len(inputs)
    out_total = int(sum(out_dims))
    assert out_total == int(weights[-1].shape[1]), \
        "sum(output term dims) must equal the last layer width"

    max_tb = max(8, int(max_tb))
    TB = _choose_batch_tile(B, max_tb)
    n_steps = int(pl.cdiv(B, TB))
    B_pad = n_steps * TB
    if B_pad != B:
        # Pad the batch so the grid tiles it exactly; padded rows are trimmed
        # from the output below (never compile a monolithic whole-batch block).
        inputs = [jnp.pad(x, ((0, B_pad - B), (0, 0))) for x in inputs]

    # Fuse the inflow 'merge': split the first-layer weight by input term.
    offs = np.cumsum([0] + in_dims)
    w0_parts = [weights[0][int(offs[t]):int(offs[t + 1]), :] for t in range(n_in)]
    params = list(w0_parts) + [biases[0]]
    for w, b in zip(weights[1:], biases[1:]):
        params.extend([w, b])

    # Batch-tiled activations; weights/biases use a constant index_map so they
    # stay VMEM-resident across batch tiles.
    in_specs = [pl.BlockSpec((TB, d), lambda i: (i, 0)) for d in in_dims]
    in_specs += [pl.BlockSpec(p.shape, lambda i: (0, 0)) for p in params]
    out_specs = pl.BlockSpec((TB, out_total), lambda i: (i, 0))
    out_shape = jax.ShapeDtypeStruct((B_pad, out_total), io_dtype)

    act_bytes = int(jnp.dtype(io_dtype).itemsize)
    flops = 2 * B_pad * sum(int(w.shape[0]) * int(w.shape[1]) for w in weights)
    transcendentals = B_pad * sum(int(w.shape[1]) for w in weights)
    bytes_accessed = (act_bytes * B_pad * (sum(in_dims) + out_total)
                      + 4 * (sum(int(w.size) for w in weights)
                             + sum(int(b.size) for b in biases)))

    kernel = functools.partial(mlp_kernel, n_in=n_in)
    y = pl.pallas_call(
        kernel,
        out_shape=out_shape,
        grid=(n_steps,),
        in_specs=in_specs,
        out_specs=out_specs,
        compiler_params=pltpu.CompilerParams(
            dimension_semantics=("parallel",)),
        cost_estimate=pl.CostEstimate(
            flops=int(flops),
            transcendentals=int(transcendentals),
            bytes_accessed=int(bytes_accessed)),
    )(*inputs, *params)

    # Outflow 'fork': contiguous column slices of the fused slab + trim padding.
    outs, off = [], 0
    for d in out_dims:
        outs.append(y[:B, off:off + d])
        off += d
    return outs


# ---- end-to-end module equivalent -------------------------------------------
def mlp_apply(state_dict, weights, biases, *, max_tb=8192):
    # NOTE: the tiny-batch path is dispatch/latency bound; batch multiple
    # timesteps / agent instances into one call to amortize launch + weight DMA.
    out_dims = [STATE_SPEC[t][0] for t in OUTPUTS]
    outs = mlp_forward([state_dict[t] for t in INPUTS], weights, biases,
                       out_dims, max_tb=max_tb)
    for t, o in zip(OUTPUTS, outs):
        state_dict[t] = o
    return state_dict, outs


if __name__ == "__main__":
    key = jax.random.PRNGKey(0)

    in_dim = sum(STATE_SPEC[t][0] for t in INPUTS)     # 32
    out_dim = sum(STATE_SPEC[t][0] for t in OUTPUTS)   # 16
    layer_dims = [int(round(i)) for i in np.linspace(in_dim, out_dim, N_LAYERS + 1)]
    # e.g. [32, 27, 21, 16]

    # Deterministic parameter init (PyTorch nn.Linear default: U(-1/sqrt(fan_in), .))
    weights, biases = [], []
    for i in range(1, len(layer_dims)):
        fan_in, fan_out = layer_dims[i - 1], layer_dims[i]
        key, kw, kb = jax.random.split(key, 3)
        bound = 1.0 / np.sqrt(fan_in)
        # layout: kernel weight is (in_features, out_features) = torch weight.T
        w = jax.random.uniform(kw, (fan_in, fan_out), jnp.float32, -bound, bound)
        b = jax.random.uniform(kb, (1, fan_out), jnp.float32, -bound, bound)
        weights.append(w)
        biases.append(b)

    def reference(state):
        h = jnp.concatenate([state[t].astype(jnp.float32) for t in INPUTS], axis=1)
        for w, b in zip(weights, biases):
            h = jnp.tanh(h @ w + b)
        return h

    def make_state(key, B, dtype):
        state = {}
        for t in INPUTS:
            key, k = jax.random.split(key)
            state[t] = jax.random.normal(
                k, (B, STATE_SPEC[t][0]), dtype=jnp.float32).astype(dtype)
        return key, state

    def fused(outs, cast=np.float32):
        return np.concatenate(
            [np.asarray(jnp.asarray(o, jnp.float32)) for o in outs], axis=1)

    # --- tiny-batch path (B=8, single step, f32, strict check) --------------
    B = 8
    key, state = make_state(key, B, jnp.float32)
    state, outs = mlp_apply(state, weights, biases)
    outs = jax.block_until_ready(outs)
    y_ref = np.asarray(reference(state))
    assert np.allclose(fused(outs), y_ref, atol=1e-5, rtol=1e-5), \
        "kernel/reference mismatch (B=8, f32)"
    assert state["mu"].shape == (B, 8) and state["logvar"].shape == (B, 8)
    assert state["mu"].dtype == jnp.float32

    # --- non-divisible batch: padded + tiled grid, f32 -----------------------
    Bn = 1000                       # TB=256 -> grid=(4,), batch padded to 1024
    key, state_n = make_state(key, Bn, jnp.float32)
    _, outs_n = mlp_apply(state_n, weights, biases, max_tb=256)
    outs_n = jax.block_until_ready(outs_n)
    yn_ref = np.asarray(reference(state_n))
    assert np.allclose(fused(outs_n), yn_ref, atol=1e-5, rtol=1e-5), \
        "kernel/reference mismatch (B=1000, padded grid)"
    assert outs_n[0].shape == (Bn, 8) and outs_n[1].shape == (Bn, 8)

    # --- bf16 activation I/O path (large-B, >=2 parallel steps) --------------
    Bh = 512                        # default max_tb -> TB=256, grid=(2,)
    key, state_h = make_state(key, Bh, jnp.bfloat16)
    _, outs_h = mlp_apply(state_h, weights, biases)
    outs_h = jax.block_until_ready(outs_h)
    yh_ref = np.asarray(reference(state_h))       # f32 math on bf16 inputs
    assert outs_h[0].dtype == jnp.bfloat16
    assert np.allclose(fused(outs_h), yh_ref, atol=2e-2, rtol=2e-2), \
        "kernel/reference mismatch (B=512, bf16 I/O)"

    print("KERNEL_OK")
</pallas_src>

<mosaic_0001>
module attributes {stable_mosaic.version = 11 : i64} {
  func.func @mlp_kernel(%arg0: i32, %arg1: memref<8x16xf32, #tpu.memory_space<vmem>>, %arg2: memref<8x16xf32, #tpu.memory_space<vmem>>, %arg3: memref<16x27xf32, #tpu.memory_space<vmem>>, %arg4: memref<16x27xf32, #tpu.memory_space<vmem>>, %arg5: memref<1x27xf32, #tpu.memory_space<vmem>>, %arg6: memref<27x21xf32, #tpu.memory_space<vmem>>, %arg7: memref<1x21xf32, #tpu.memory_space<vmem>>, %arg8: memref<21x16xf32, #tpu.memory_space<vmem>>, %arg9: memref<1x16xf32, #tpu.memory_space<vmem>>, %arg10: memref<8x16xf32, #tpu.memory_space<vmem>>) attributes {dimension_semantics = [#tpu.dimension_semantics<parallel>], iteration_bounds = array<i64: 1>, scalar_prefetch = 0 : i64, scratch_operands = 0 : i64, tpu.core_type = #tpu.core_type<tc>, window_params = [{transform_indices = @transform_0, window_bounds = array<i64: 8, 16>}, {transform_indices = @transform_1, window_bounds = array<i64: 8, 16>}, {pipeline_mode = #tpu.pipeline_mode<synchronous>, transform_indices = @transform_2, window_bounds = array<i64: 16, 27>}, {pipeline_mode = #tpu.pipeline_mode<synchronous>, transform_indices = @transform_3, window_bounds = array<i64: 16, 27>}, {pipeline_mode = #tpu.pipeline_mode<synchronous>, transform_indices = @transform_4, window_bounds = array<i64: 1, 27>}, {pipeline_mode = #tpu.pipeline_mode<synchronous>, transform_indices = @transform_5, window_bounds = array<i64: 27, 21>}, {pipeline_mode = #tpu.pipeline_mode<synchronous>, transform_indices = @transform_6, window_bounds = array<i64: 1, 21>}, {pipeline_mode = #tpu.pipeline_mode<synchronous>, transform_indices = @transform_7, window_bounds = array<i64: 21, 16>}, {pipeline_mode = #tpu.pipeline_mode<synchronous>, transform_indices = @transform_8, window_bounds = array<i64: 1, 16>}, {transform_indices = @transform_9, window_bounds = array<i64: 8, 16>}]} {
    %c0 = arith.constant 0 : index
    %c0_0 = arith.constant 0 : index
    %0 = vector.load %arg5[%c0, %c0_0] : memref<1x27xf32, #tpu.memory_space<vmem>>, vector<1x27xf32>
    %c0_1 = arith.constant 0 : index
    %c0_2 = arith.constant 0 : index
    %1 = vector.load %arg1[%c0_1, %c0_2] : memref<8x16xf32, #tpu.memory_space<vmem>>, vector<8x16xf32>
    %c0_3 = arith.constant 0 : index
    %c0_4 = arith.constant 0 : index
    %2 = vector.load %arg3[%c0_3, %c0_4] : memref<16x27xf32, #tpu.memory_space<vmem>>, vector<16x27xf32>
    %cst = arith.constant dense<0.000000e+00> : vector<8x27xf32>
    %3 = tpu.matmul %1, %2, %cst {dimension_numbers = #tpu.dot_dimension_numbers<[1], [0], [0], [1], [0, 0, 1, 1], [], []>} : vector<8x16xf32>, vector<16x27xf32>, vector<8x27xf32> -> vector<8x27xf32>
    %c0_5 = arith.constant 0 : index
    %c0_6 = arith.constant 0 : index
    %4 = vector.load %arg2[%c0_5, %c0_6] : memref<8x16xf32, #tpu.memory_space<vmem>>, vector<8x16xf32>
    %c0_7 = arith.constant 0 : index
    %c0_8 = arith.constant 0 : index
    %5 = vector.load %arg4[%c0_7, %c0_8] : memref<16x27xf32, #tpu.memory_space<vmem>>, vector<16x27xf32>
    %cst_9 = arith.constant dense<0.000000e+00> : vector<8x27xf32>
    %6 = tpu.matmul %4, %5, %cst_9 {dimension_numbers = #tpu.dot_dimension_numbers<[1], [0], [0], [1], [0, 0, 1, 1], [], []>} : vector<8x16xf32>, vector<16x27xf32>, vector<8x27xf32> -> vector<8x27xf32>
    %7 = arith.addf %3, %6 : vector<8x27xf32>
    %8 = vector.broadcast %0 : vector<1x27xf32> to vector<8x27xf32>
    %9 = arith.addf %7, %8 : vector<8x27xf32>
    %10 = math.tanh %9 : vector<8x27xf32>
    %c0_10 = arith.constant 0 : index
    %c0_11 = arith.constant 0 : index
    %11 = vector.load %arg6[%c0_10, %c0_11] : memref<27x21xf32, #tpu.memory_space<vmem>>, vector<27x21xf32>
    %c0_12 = arith.constant 0 : index
    %c0_13 = arith.constant 0 : index
    %12 = vector.load %arg7[%c0_12, %c0_13] : memref<1x21xf32, #tpu.memory_space<vmem>>, vector<1x21xf32>
    %cst_14 = arith.constant dense<0.000000e+00> : vector<8x21xf32>
    %13 = tpu.matmul %10, %11, %cst_14 {dimension_numbers = #tpu.dot_dimension_numbers<[1], [0], [0], [1], [0, 0, 1, 1], [], []>} : vector<8x27xf32>, vector<27x21xf32>, vector<8x21xf32> -> vector<8x21xf32>
    %14 = vector.broadcast %12 : vector<1x21xf32> to vector<8x21xf32>
    %15 = arith.addf %13, %14 : vector<8x21xf32>
    %16 = math.tanh %15 : vector<8x21xf32>
    %c0_15 = arith.constant 0 : index
    %c0_16 = arith.constant 0 : index
    %17 = vector.load %arg8[%c0_15, %c0_16] : memref<21x16xf32, #tpu.memory_space<vmem>>, vector<21x16xf32>
    %c0_17 = arith.constant 0 : index
    %c0_18 = arith.constant 0 : index
    %18 = vector.load %arg9[%c0_17, %c0_18] : memref<1x16xf32, #tpu.memory_space<vmem>>, vector<1x16xf32>
    %cst_19 = arith.constant dense<0.000000e+00> : vector<8x16xf32>
    %19 = tpu.matmul %16, %17, %cst_19 {dimension_numbers = #tpu.dot_dimension_numbers<[1], [0], [0], [1], [0, 0, 1, 1], [], []>} : vector<8x21xf32>, vector<21x16xf32>, vector<8x16xf32> -> vector<8x16xf32>
    %20 = vector.broadcast %18 : vector<1x16xf32> to vector<8x16xf32>
    %21 = arith.addf %19, %20 : vector<8x16xf32>
    %22 = math.tanh %21 : vector<8x16xf32>
    %c0_20 = arith.constant 0 : index
    %c0_21 = arith.constant 0 : index
    %23 = vector.load %arg10[%c0_20, %c0_21] : memref<8x16xf32, #tpu.memory_space<vmem>>, vector<8x16xf32>
    tpu.vector_store %arg10[%c0_20, %c0_21], %22 {strides = array<i32>} : memref<8x16xf32, #tpu.memory_space<vmem>>, vector<8x16xf32>,
    return
  }
  func.func @transform_0(%arg0: i32) -> (i32, i32) {
    %c0_i32 = arith.constant 0 : i32
    %c0_i32_0 = arith.constant 0 : i32
    return %arg0, %c0_i32 : i32, i32
  }
  func.func @transform_1(%arg0: i32) -> (i32, i32) {
    %c0_i32 = arith.constant 0 : i32
    %c0_i32_0 = arith.constant 0 : i32
    return %arg0, %c0_i32 : i32, i32
  }
  func.func @transform_2(%arg0: i32) -> (i32, i32) {
    %c0_i32 = arith.constant 0 : i32
    %c0_i32_0 = arith.constant 0 : i32
    %c0_i32_1 = arith.constant 0 : i32
    return %c0_i32, %c0_i32_0 : i32, i32
  }
  func.func @transform_3(%arg0: i32) -> (i32, i32) {
    %c0_i32 = arith.constant 0 : i32
    %c0_i32_0 = arith.constant 0 : i32
    %c0_i32_1 = arith.constant 0 : i32
    return %c0_i32, %c0_i32_0 : i32, i32
  }
  func.func @transform_4(%arg0: i32) -> (i32, i32) {
    %c0_i32 = arith.constant 0 : i32
    %c0_i32_0 = arith.constant 0 : i32
    %c0_i32_1 = arith.constant 0 : i32
    return %c0_i32, %c0_i32_0 : i32, i32
  }
  func.func @transform_5(%arg0: i32) -> (i32, i32) {
    %c0_i32 = arith.constant 0 : i32
    %c0_i32_0 = arith.constant 0 : i32
    %c0_i32_1 = arith.constant 0 : i32
    return %c0_i32, %c0_i32_0 : i32, i32
  }
  func.func @transform_6(%arg0: i32) -> (i32, i32) {
    %c0_i32 = arith.constant 0 : i32
    %c0_i32_0 = arith.constant 0 : i32
    %c0_i32_1 = arith.constant 0 : i32
    return %c0_i32, %c0_i32_0 : i32, i32
  }
  func.func @transform_7(%arg0: i32) -> (i32, i32) {
    %c0_i32 = arith.constant 0 : i32
    %c0_i32_0 = arith.constant 0 : i32
    %c0_i32_1 = arith.constant 0 : i32
    return %c0_i32, %c0_i32_0 : i32, i32
  }
  func.func @transform_8(%arg0: i32) -> (i32, i32) {
    %c0_i32 = arith.constant 0 : i32
    %c0_i32_0 = arith.constant 0 : i32
    %c0_i32_1 = arith.constant 0 : i32
    return %c0_i32, %c0_i32_0 : i32, i32
  }
  func.func @transform_9(%arg0: i32) -> (i32, i32) {
    %c0_i32 = arith.constant 0 : i32
    %c0_i32_0 = arith.constant 0 : i32
    return %arg0, %c0_i32 : i32, i32
  }
}

</mosaic_0001>

<bundles_post_ra>
// kernel: tpu_custom_call.1
= control target key start
LH: loop header
LB: loop body
LE: loop exit
PB: predicated region body
PF: predicated region fallthrough
CT: control target
= control target key end

     0   :  { %v478_v2 = vmov 0.0   ;;  %s585_s0 = inlined_call_operand.vmem [shape: f32[8,16], index: 0, kind: input, shape index: {}]   ;;  %s586_s1 = inlined_call_operand.vmem [shape: f32[8,16], index: 1, kind: input, shape index: {}]   ;;  %s587_s2 = inlined_call_operand.vmem [shape: f32[16,27], index: 2, kind: input, shape index: {}]   ;;  %s588_s3 = inlined_call_operand.vmem [shape: f32[16,27], index: 3, kind: input, shape index: {}]   ;;  %s589_s4 = inlined_call_operand.vmem [shape: f32[1,27], index: 4, kind: input, shape index: {}]   ;;  %s590_s5 = inlined_call_operand.vmem [shape: f32[27,21], index: 5, kind: input, shape index: {}]   ;;  %s591_s6 = inlined_call_operand.vmem [shape: f32[1,21], index: 6, kind: input, shape index: {}]   ;;  %s592_s7 = inlined_call_operand.vmem [shape: f32[21,16], index: 7, kind: input, shape index: {}]   ;;  %s593_s8 = inlined_call_operand.vmem [shape: f32[1,16], index: 8, kind: input, shape index: {}]   ;;  %s594_s9 = inlined_call_operand.hbm [shape: f32[8,16], index: 9, kind: output, shape index: {}]  }
   0x1   :  { %v39_v0 = vld [vmem:[%s588_s3 + $0x8] sm:$0xff]  ;;  %413 = vmatprep.subr.mxu0 %v478_v2  ;;  %420 = vmatprep.subr.mxu1 %v478_v2  ;;  %v38_v3 = vld [vmem:[%s588_s3] sm:$0xff] }
   0x2   :  { %v36_v1 = vld [vmem:[%s587_s2 + $0x8] sm:$0xff]  ;;  %414 = vmatpush3.msra.mxu0 %v39_v0  ;;  %v35_v4 = vld [vmem:[%s587_s2] sm:$0xff] }
   0x3   :  { %421 = vmatpush3.msra.mxu1 %v36_v1 }
   0x4   :  { %14 = vsyncpa [#allocation3], 0  ;;  %415 = vmatprep.subr.mxu0 %v478_v2  ;;  %422 = vmatprep.subr.mxu1 %v478_v2  ;;  %v37_v5 = vld [vmem:[%s586_s1] sm:$0xff]  ;;  %vm40_vm0 = vcmask 130048   ;;  %vm479_vm1 = vmmov 0   ;;  %vm210_vm2 = vcmask 1042432  }
   0x5   :  { %v34_v6 = vld [vmem:[%s585_s0] sm:$0xff]  ;;  %416 = vmatpush3.msra.mxu0 %v38_v3  ;;  %417 = vmatprep.mubr.msk.f32.mxu0 %vm479_vm1, %v478_v2  ;;  %v198_v7 = vld [vmem:[%s590_s5 + $0x18] sm:$0x7]  ;;  %v197_v8 = vld [vmem:[%s590_s5 + $0x10] sm:$0xff]  ;;  %vm206_vm3 = vcmask 220160   ;;  %vm299_vm4 = vcmask 1044480  }
   0x6   :  { %423 = vmatpush3.msra.mxu1 %v35_v4  ;;  %424 = vmatprep.mubr.msk.f32.mxu1 %vm479_vm1, %v478_v2  ;;  %v196_v9 = vld [vmem:[%s590_s5 + $0x8] sm:$0xff]  ;;  %v195_v10 = vld [vmem:[%s590_s5] sm:$0xff]  ;;  %v287_v19 = vld [vmem:[%s592_s7 + $0x10] sm:$0x1f]  ;;  %vm295_vm5 = vcmask 171008  }
   0x7   :  { %418 = vmatmul.mubr.msk.f32.vlgmr.msra.gmra.mxu0 %vm40_vm0, %v37_v5  ;;  %425 = vmatmul.mubr.msk.f32.vlgmr.msra.gmra.mxu1 %vm40_vm0, %v34_v6  ;;  %v391_v12 = vld [vmem:[%s589_s4] ss:$0 sm:$0xff]  ;;  %v286_v20 = vld [vmem:[%s592_s7 + $0x8] sm:$0xff] }
   0x8   :  { %427 = vmatprep.subr.mxu0 %v478_v2  ;;  %435 = vmatprep.mubr.msk.f32.mxu0 %vm479_vm1, %v478_v2  ;;  %v285_v21 = vld [vmem:[%s592_s7] sm:$0xff]  ;;  %s480_s7 = smov [#allocation2]  }
   0x9   :  { %438 = vmatprep.subr.mxu1 %v478_v2  ;;  %444 = vmatprep.mubr.msk.f32.mxu1 %vm479_vm1, %v478_v2  ;;  %v392_v22 = vld [vmem:[%s591_s6] ss:$0 sm:$0xff]  ;;  %s381_s14 = sshll.u32 %s480_s7, 4  ;;  %s382_s14 = int_to_ptr.vmem [resolvable:$true] %s381_s14 }
   0xa   :  { %428 = vmatpush3.msk.msra.mxu0 %vm210_vm2, %v198_v7  ;;  %439 = vmatpush3.msk.msra.mxu1 %vm299_vm4, %v287_v19  ;;  %v395_v27 = vld [vmem:[%s593_s8] ss:$0 sm:$0xff]  ;;  %s456_s6 = scalar_lea.vmem %s382_s14, 128  ;;  %p461_p1 = scmp.lt.s32.totalorder %s382_s14, %s382_s14 }
   0xb   :  { %429 = vmatprep.subr.mxu0 %v478_v2  ;;  %440 = vmatprep.subr.mxu1 %v478_v2  ;;  %p457_p0 = scmp.ne.s32.totalorder %s382_s14, %s456_s6  ;;  %p462_p2 = scmp.lt.s32.totalorder %s456_s6, %s456_s6 }
   0xc   :  { %430 = vmatpush3.msra.mxu0 %v197_v8  ;;  %441 = vmatpush3.msra.mxu1 %v286_v20 }
   0xd   :  { %431 = vmatprep.subr.mxu0 %v478_v2  ;;  %442 = vmatprep.subr.mxu1 %v478_v2  ;;  %p463_p3 = por %p462_p2, %p461_p1 }
   0xe   :  { %432 = vmatpush3.msra.mxu0 %v196_v9  ;;  %443 = vmatpush3.msra.mxu1 %v285_v21 }
   0xf   :  { %433 = vmatprep.subr.mxu0 %v478_v2  ;;  %p464_p4 = pnand %p463_p3, %p457_p0 }
  0x10   :  { %434 = vmatpush3.msra.mxu0 %v195_v10 }
  0xc7   :  { %v110_v11 = vpop.f32.mrf.mxu0  ;;  %v183_v13 = vpop.f32.mrf.mxu1 }
  0xc8   :  { %v184_v14 = vadd.f32 %v183_v13, %v110_v11 }
  0xc9   :  { %v419_v15 = vpop.f32.mrf.mxu0  ;;  %v426_v16 = vpop.f32.mrf.mxu1 }
  0xca   :  { %v193_v17 = vadd.f32 %v391_v12, %v184_v14 }
  0xcc   :  { %450 = vtanh.f32 %v193_v17 }
  0xd9   :  { %v451_v18 = vpop.eup %450 }
  0xda   :  { %436 = vmatmul.mubr.msk.f32.vlgmr.msra.gmra.mxu0 %vm206_vm3, %v451_v18 }
 0x19a   :  { %v280_v23 = vpop.f32.mrf.mxu0 }
 0x19b   :  { %v281_v24 = vadd.f32 %v392_v22, %v280_v23 }
 0x19c   :  { %v437_v25 = vpop.f32.mrf.mxu0 }
 0x19d   :  { %452 = vtanh.f32 %v281_v24 }
 0x1aa   :  { %v453_v26 = vpop.eup %452 }
 0x1ab   :  { %445 = vmatmul.mubr.msk.f32.vlgmr.msra.gmra.mxu1 %vm295_vm5, %v453_v26 }
 0x26b   :  { %v369_v28 = vpop.f32.mrf.mxu1 }
 0x26c   :  { %v370_v29 = vadd.f32 %v395_v27, %v369_v28 }
 0x26d   :  { %v446_v30 = vpop.f32.mrf.mxu1 }
 0x26e   :  { %454 = vtanh.f32 %v370_v29 }
 0x27b   :  { %v455_v31 = vpop.eup %454 }
 0x27c   :  { %374 = vst.msk [vmem:[#allocation2] sm:$0xff] %vm40_vm0, %v455_v31 }
 0x27d   :  { %467 = shalt.err (!%p464_p4)
}
 0x27e   :  { %384 = dma.vmem_to_hbm [thread:$0]  %s382_s14, 128, %s594_s9, [#allocation3]  }
 0x27f   :  { %476 = dma.done.wait [#allocation3], 128  }
 0x280   :  { %477 = vsyncadd [#allocation3], 4294967168 }
 0x281   :  { %388 = vsyncpa [#allocation3], 1 }

</bundles_post_ra>
